<compile_context>
chip_gen: v6e
topology: v6e:2x2x1
jax: 0.10.0
libtpu: 0.0.40
codegen_flags: <defaults>
</compile_context>

<pallas_src>
import jax
import jax.numpy as jnp
from jax.experimental import pallas as pl
from jax.experimental.pallas import tpu as pltpu

HIDDEN = 128
LANE = 128       # lane width: pad N of fc3 to this
TILE_2ND = 16    # batch-tile granularity (covers bf16 sublane packing of the output)


def _round_up(x, m):
    return ((x + m - 1) // m) * m


def _cdiv(a, b):
    return -(-a // b)


def qnetwork_kernel(x_ref, w1_ref, b1_ref, w2_ref, b2_ref, w3_ref, b3_ref, o_ref):
    """Fused 3-layer MLP on one (tb, ·) batch tile.

    x (tb, obs_dim) f32, w1 (obs_dim, 128) f32, w2/w3 bf16, biases f32.
    fc1 runs fully in f32 (tiny K); fc2/fc3 use bf16 MXU inputs with f32
    accumulation.  Output is stored as bf16 (padded to 128 lanes).
    """
    x = x_ref[...]                                                     # (tb, obs_dim) f32

    h1 = jnp.dot(x, w1_ref[...], preferred_element_type=jnp.float32) + b1_ref[...]
    h1 = jnp.maximum(h1, 0.0)

    h2 = jnp.dot(h1.astype(jnp.bfloat16), w2_ref[...],
                 preferred_element_type=jnp.float32) + b2_ref[...]
    h2 = jnp.maximum(h2, 0.0)

    out = jnp.dot(h2.astype(jnp.bfloat16), w3_ref[...],
                  preferred_element_type=jnp.float32) + b3_ref[...]
    o_ref[...] = out.astype(o_ref.dtype)                              # bf16 store


def qnetwork_forward(x, params, n_actions, *, max_tile=1024, slice_output=True):
    """Run the fused MLP Pallas kernel.

    x:      (B, obs_dim) float32
    params: from init_params():
              w1 (obs_dim, 128) f32     b1 (1, 128) f32
              w2 (128, 128)     bf16    b2 (1, 128) f32
              w3 (128, n_pad)   bf16    b3 (1, n_pad) f32   (padded lanes zero)
    returns (B, n_actions) f32 if slice_output else the padded (b_pad, n_pad)
    bf16 buffer whose valid region is [:B, :n_actions].
    """
    B, obs_dim = x.shape
    hidden = params["w2"].shape[0]
    n_pad = params["w3"].shape[1]

    # Batch tile: multiple of 16 sublanes; when B > 16 cap at ceil(B/2) so the
    # grid has >= 2 steps (both TensorCores busy on v7x); cap at max_tile.
    if B > TILE_2ND:
        tb = min(max_tile, _round_up(_cdiv(B, 2), TILE_2ND))
    else:
        tb = _round_up(B, TILE_2ND)
    grid_n = _cdiv(B, tb)
    b_pad = grid_n * tb

    # Only the (cheap) batch-rows get padded; obs_dim lanes are passed as-is.
    if b_pad != B:
        x = jnp.pad(x, ((0, b_pad - B), (0, 0)))

    resident = lambda arr: pl.BlockSpec(arr.shape, lambda i: (0, 0))

    flops = 2 * b_pad * (obs_dim * hidden + hidden * hidden + hidden * n_pad)
    bytes_accessed = int(
        b_pad * obs_dim * 4                      # x in (f32)
        + b_pad * n_pad * 2                      # out (bf16)
        + sum(int(p.size) * p.dtype.itemsize for p in params.values())
    )

    out = pl.pallas_call(
        qnetwork_kernel,
        out_shape=jax.ShapeDtypeStruct((b_pad, n_pad), jnp.bfloat16),
        grid=(grid_n,),
        in_specs=[
            pl.BlockSpec((tb, obs_dim), lambda i: (i, 0)),   # x: batch-tiled, real K
            resident(params["w1"]),
            resident(params["b1"]),
            resident(params["w2"]),
            resident(params["b2"]),
            resident(params["w3"]),
            resident(params["b3"]),
        ],
        out_specs=pl.BlockSpec((tb, n_pad), lambda i: (i, 0)),
        compiler_params=pltpu.CompilerParams(
            dimension_semantics=("parallel",),
        ),
        cost_estimate=pl.CostEstimate(
            flops=flops, transcendentals=0, bytes_accessed=bytes_accessed),
    )(x, params["w1"], params["b1"], params["w2"], params["b2"],
      params["w3"], params["b3"])

    if slice_output:
        return out[:B, :n_actions].astype(jnp.float32)
    return out


def init_params(key, obs_dim, n_actions, hidden=HIDDEN):
    """PyTorch-Linear-style init (uniform +/- 1/sqrt(fan_in)).

    Layout:
      w1 (obs_dim, hidden) f32 (unpadded -- tiny, keeps fc1 exact)
      w2 (hidden, hidden)  bf16
      w3 (hidden, n_pad)   bf16 (cols >= n_actions zero), b3 (1, n_pad) f32 zero-padded
    """
    ks = jax.random.split(key, 6)

    def linear(kw, kb, fan_in, fan_out):
        bound = 1.0 / jnp.sqrt(jnp.float32(fan_in))
        w = jax.random.uniform(kw, (fan_in, fan_out), jnp.float32, -bound, bound)
        b = jax.random.uniform(kb, (1, fan_out), jnp.float32, -bound, bound)
        return w, b

    w1, b1 = linear(ks[0], ks[1], obs_dim, hidden)
    w2, b2 = linear(ks[2], ks[3], hidden, hidden)
    w3, b3 = linear(ks[4], ks[5], hidden, n_actions)

    n_pad = _round_up(n_actions, LANE)               # pad N of fc3 to 128
    w3_p = jnp.zeros((hidden, n_pad), jnp.float32).at[:, :n_actions].set(w3)
    b3_p = jnp.zeros((1, n_pad), jnp.float32).at[:, :n_actions].set(b3)

    return {
        "w1": w1,                        "b1": b1,
        "w2": w2.astype(jnp.bfloat16),   "b2": b2,
        "w3": w3_p.astype(jnp.bfloat16), "b3": b3_p,
    }


def qnetwork_reference(x, p, n_actions):
    """Pure-JAX reference with the same mixed precision as the kernel."""
    h1 = jnp.maximum(x @ p["w1"] + p["b1"], 0.0)
    h2 = jnp.maximum(
        jnp.dot(h1.astype(jnp.bfloat16), p["w2"], preferred_element_type=jnp.float32)
        + p["b2"], 0.0)
    out = jnp.dot(h2.astype(jnp.bfloat16), p["w3"], preferred_element_type=jnp.float32) + p["b3"]
    return out.astype(jnp.bfloat16)[:, :n_actions].astype(jnp.float32)


def qnetwork_reference_f32(x, p, n_actions):
    """Full-f32 reference of the original module semantics (loose check)."""
    h1 = jnp.maximum(x @ p["w1"] + p["b1"], 0.0)
    h2 = jnp.maximum(h1 @ p["w2"].astype(jnp.float32) + p["b2"], 0.0)
    out = h2 @ p["w3"].astype(jnp.float32) + p["b3"]
    return out[:, :n_actions]


if __name__ == "__main__":
    key = jax.random.PRNGKey(0)
    k_param, k_x1, k_x2 = jax.random.split(key, 3)

    # Small shapes consistent with a classic-control DQN: obs_dim=4, 2 actions.
    obs_dim, n_actions = 4, 2
    params = init_params(k_param, obs_dim, n_actions)

    # Case 1: tiny acting-path batch (single grid step).
    x1 = jax.random.normal(k_x1, (8, obs_dim), jnp.float32)
    out1 = jax.block_until_ready(qnetwork_forward(x1, params, n_actions))
    assert out1.shape == (8, n_actions)
    assert jnp.allclose(out1, qnetwork_reference(x1, params, n_actions),
                        atol=1e-2, rtol=1e-2), "mismatch vs mixed-precision reference (B=8)"
    assert jnp.allclose(out1, qnetwork_reference_f32(x1, params, n_actions),
                        atol=5e-2, rtol=5e-2), "mismatch vs f32 reference (B=8)"

    # Case 2: replay-buffer-style batch exercising grid >= 2 and ragged padding.
    x2 = jax.random.normal(k_x2, (40, obs_dim), jnp.float32)
    out2 = jax.block_until_ready(qnetwork_forward(x2, params, n_actions))
    assert out2.shape == (40, n_actions)
    assert jnp.allclose(out2, qnetwork_reference(x2, params, n_actions),
                        atol=1e-2, rtol=1e-2), "mismatch vs mixed-precision reference (B=40)"
    assert jnp.allclose(out2, qnetwork_reference_f32(x2, params, n_actions),
                        atol=5e-2, rtol=5e-2), "mismatch vs f32 reference (B=40)"

    print("KERNEL_OK")
</pallas_src>

<mosaic_0001>
module attributes {stable_mosaic.version = 11 : i64} {
  func.func @qnetwork_kernel(%arg0: i32, %arg1: memref<16x4xf32, #tpu.memory_space<vmem>>, %arg2: memref<4x128xf32, #tpu.memory_space<vmem>>, %arg3: memref<1x128xf32, #tpu.memory_space<vmem>>, %arg4: memref<128x128xbf16, #tpu.memory_space<vmem>>, %arg5: memref<1x128xf32, #tpu.memory_space<vmem>>, %arg6: memref<128x128xbf16, #tpu.memory_space<vmem>>, %arg7: memref<1x128xf32, #tpu.memory_space<vmem>>, %arg8: memref<16x128xbf16, #tpu.memory_space<vmem>>) attributes {dimension_semantics = [#tpu.dimension_semantics<parallel>], iteration_bounds = array<i64: 1>, scalar_prefetch = 0 : i64, scratch_operands = 0 : i64, tpu.core_type = #tpu.core_type<tc>, window_params = [{transform_indices = @transform_0, window_bounds = array<i64: 16, 4>}, {pipeline_mode = #tpu.pipeline_mode<synchronous>, transform_indices = @transform_1, window_bounds = array<i64: 4, 128>}, {pipeline_mode = #tpu.pipeline_mode<synchronous>, transform_indices = @transform_2, window_bounds = array<i64: 1, 128>}, {pipeline_mode = #tpu.pipeline_mode<synchronous>, transform_indices = @transform_3, window_bounds = array<i64: 128, 128>}, {pipeline_mode = #tpu.pipeline_mode<synchronous>, transform_indices = @transform_4, window_bounds = array<i64: 1, 128>}, {pipeline_mode = #tpu.pipeline_mode<synchronous>, transform_indices = @transform_5, window_bounds = array<i64: 128, 128>}, {pipeline_mode = #tpu.pipeline_mode<synchronous>, transform_indices = @transform_6, window_bounds = array<i64: 1, 128>}, {transform_indices = @transform_7, window_bounds = array<i64: 16, 128>}]} {
    %c0 = arith.constant 0 : index
    %c0_0 = arith.constant 0 : index
    %0 = vector.load %arg1[%c0, %c0_0] : memref<16x4xf32, #tpu.memory_space<vmem>>, vector<16x4xf32>
    %c0_1 = arith.constant 0 : index
    %c0_2 = arith.constant 0 : index
    %1 = vector.load %arg2[%c0_1, %c0_2] : memref<4x128xf32, #tpu.memory_space<vmem>>, vector<4x128xf32>
    %cst = arith.constant dense<0.000000e+00> : vector<16x128xf32>
    %2 = tpu.matmul %0, %1, %cst {dimension_numbers = #tpu.dot_dimension_numbers<[1], [0], [0], [1], [0, 0, 1, 1], [], []>} : vector<16x4xf32>, vector<4x128xf32>, vector<16x128xf32> -> vector<16x128xf32>
    %c0_3 = arith.constant 0 : index
    %c0_4 = arith.constant 0 : index
    %3 = vector.load %arg3[%c0_3, %c0_4] : memref<1x128xf32, #tpu.memory_space<vmem>>, vector<1x128xf32>
    %4 = vector.broadcast %3 : vector<1x128xf32> to vector<16x128xf32>
    %5 = arith.addf %2, %4 : vector<16x128xf32>
    %cst_5 = arith.constant 0.000000e+00 : f32
    %6 = vector.broadcast %cst_5 : f32 to vector<16x128xf32>
    %7 = arith.maximumf %5, %6 : vector<16x128xf32>
    %8 = arith.truncf %7 : vector<16x128xf32> to vector<16x128xbf16>
    %c0_6 = arith.constant 0 : index
    %c0_7 = arith.constant 0 : index
    %9 = vector.load %arg4[%c0_6, %c0_7] : memref<128x128xbf16, #tpu.memory_space<vmem>>, vector<128x128xbf16>
    %cst_8 = arith.constant dense<0.000000e+00> : vector<16x128xf32>
    %10 = tpu.matmul %8, %9, %cst_8 {dimension_numbers = #tpu.dot_dimension_numbers<[1], [0], [0], [1], [0, 0, 1, 1], [], []>} : vector<16x128xbf16>, vector<128x128xbf16>, vector<16x128xf32> -> vector<16x128xf32>
    %c0_9 = arith.constant 0 : index
    %c0_10 = arith.constant 0 : index
    %11 = vector.load %arg5[%c0_9, %c0_10] : memref<1x128xf32, #tpu.memory_space<vmem>>, vector<1x128xf32>
    %12 = vector.broadcast %11 : vector<1x128xf32> to vector<16x128xf32>
    %13 = arith.addf %10, %12 : vector<16x128xf32>
    %cst_11 = arith.constant 0.000000e+00 : f32
    %14 = vector.broadcast %cst_11 : f32 to vector<16x128xf32>
    %15 = arith.maximumf %13, %14 : vector<16x128xf32>
    %16 = arith.truncf %15 : vector<16x128xf32> to vector<16x128xbf16>
    %c0_12 = arith.constant 0 : index
    %c0_13 = arith.constant 0 : index
    %17 = vector.load %arg6[%c0_12, %c0_13] : memref<128x128xbf16, #tpu.memory_space<vmem>>, vector<128x128xbf16>
    %cst_14 = arith.constant dense<0.000000e+00> : vector<16x128xf32>
    %18 = tpu.matmul %16, %17, %cst_14 {dimension_numbers = #tpu.dot_dimension_numbers<[1], [0], [0], [1], [0, 0, 1, 1], [], []>} : vector<16x128xbf16>, vector<128x128xbf16>, vector<16x128xf32> -> vector<16x128xf32>
    %c0_15 = arith.constant 0 : index
    %c0_16 = arith.constant 0 : index
    %19 = vector.load %arg7[%c0_15, %c0_16] : memref<1x128xf32, #tpu.memory_space<vmem>>, vector<1x128xf32>
    %20 = vector.broadcast %19 : vector<1x128xf32> to vector<16x128xf32>
    %21 = arith.addf %18, %20 : vector<16x128xf32>
    %22 = arith.truncf %21 : vector<16x128xf32> to vector<16x128xbf16>
    %c0_17 = arith.constant 0 : index
    %c0_18 = arith.constant 0 : index
    %23 = vector.load %arg8[%c0_17, %c0_18] : memref<16x128xbf16, #tpu.memory_space<vmem>>, vector<16x128xbf16>
    tpu.vector_store %arg8[%c0_17, %c0_18], %22 {strides = array<i32>} : memref<16x128xbf16, #tpu.memory_space<vmem>>, vector<16x128xbf16>,
    return
  }
  func.func @transform_0(%arg0: i32) -> (i32, i32) {
    %c0_i32 = arith.constant 0 : i32
    %c0_i32_0 = arith.constant 0 : i32
    return %arg0, %c0_i32 : i32, i32
  }
  func.func @transform_1(%arg0: i32) -> (i32, i32) {
    %c0_i32 = arith.constant 0 : i32
    %c0_i32_0 = arith.constant 0 : i32
    %c0_i32_1 = arith.constant 0 : i32
    return %c0_i32, %c0_i32_0 : i32, i32
  }
  func.func @transform_2(%arg0: i32) -> (i32, i32) {
    %c0_i32 = arith.constant 0 : i32
    %c0_i32_0 = arith.constant 0 : i32
    %c0_i32_1 = arith.constant 0 : i32
    return %c0_i32, %c0_i32_0 : i32, i32
  }
  func.func @transform_3(%arg0: i32) -> (i32, i32) {
    %c0_i32 = arith.constant 0 : i32
    %c0_i32_0 = arith.constant 0 : i32
    %c0_i32_1 = arith.constant 0 : i32
    return %c0_i32, %c0_i32_0 : i32, i32
  }
  func.func @transform_4(%arg0: i32) -> (i32, i32) {
    %c0_i32 = arith.constant 0 : i32
    %c0_i32_0 = arith.constant 0 : i32
    %c0_i32_1 = arith.constant 0 : i32
    return %c0_i32, %c0_i32_0 : i32, i32
  }
  func.func @transform_5(%arg0: i32) -> (i32, i32) {
    %c0_i32 = arith.constant 0 : i32
    %c0_i32_0 = arith.constant 0 : i32
    %c0_i32_1 = arith.constant 0 : i32
    return %c0_i32, %c0_i32_0 : i32, i32
  }
  func.func @transform_6(%arg0: i32) -> (i32, i32) {
    %c0_i32 = arith.constant 0 : i32
    %c0_i32_0 = arith.constant 0 : i32
    %c0_i32_1 = arith.constant 0 : i32
    return %c0_i32, %c0_i32_0 : i32, i32
  }
  func.func @transform_7(%arg0: i32) -> (i32, i32) {
    %c0_i32 = arith.constant 0 : i32
    %c0_i32_0 = arith.constant 0 : i32
    return %arg0, %c0_i32 : i32, i32
  }
}

</mosaic_0001>

<bundles_post_ra>
// kernel: tpu_custom_call.1
= control target key start
LH: loop header
LB: loop body
LE: loop exit
PB: predicated region body
PF: predicated region fallthrough
CT: control target
= control target key end

     0   :  { %12 = vsyncpa [#allocation3], 0  ;;  %s697_s0 = inlined_call_operand.vmem [shape: f32[16,4], index: 0, kind: input, shape index: {}]   ;;  %s698_s1 = inlined_call_operand.vmem [shape: f32[4,128], index: 1, kind: input, shape index: {}]   ;;  %s699_s2 = inlined_call_operand.vmem [shape: f32[1,128], index: 2, kind: input, shape index: {}]   ;;  %s700_s3 = inlined_call_operand.hbm [shape: bf16[128,128], index: 3, kind: input, shape index: {}]   ;;  %s701_s4 = inlined_call_operand.vmem [shape: f32[1,128], index: 4, kind: input, shape index: {}]   ;;  %s702_s5 = inlined_call_operand.hbm [shape: bf16[128,128], index: 5, kind: input, shape index: {}]   ;;  %s703_s6 = inlined_call_operand.vmem [shape: f32[1,128], index: 6, kind: input, shape index: {}]   ;;  %s704_s7 = inlined_call_operand.hbm [shape: bf16[16,128], index: 7, kind: output, shape index: {}]  }
   0x1   :  { %13 = vsyncpa [#allocation6], 0 }
   0x2   :  { %14 = vsyncpa [#allocation4], 0  ;;  %s596_s24 = smov [#allocation2]  }
   0x3   :  { %s26_s25 = sshll.u32 %s596_s24, 4  ;;  %s27_s25 = int_to_ptr.vmem [resolvable:$true] %s26_s25 }
   0x4   :  { %s538_s26 = scalar_lea.vmem %s27_s25, 1024  ;;  %p543_p1 = scmp.lt.s32.totalorder %s27_s25, %s27_s25 }
   0x5   :  { %p539_p0 = scmp.ne.s32.totalorder %s27_s25, %s538_s26  ;;  %p544_p2 = scmp.lt.s32.totalorder %s538_s26, %s538_s26 }
   0x7   :  { %p545_p3 = por %p544_p2, %p543_p1 }
   0x9   :  { %p546_p4 = pnand %p545_p3, %p539_p0 }
   0xb   :  { %549 = shalt.err (!%p546_p4)
}
   0xc   :  { %s597_s27 = smov 64   ;;  %s598_s28 = smov 4  }
   0xd   :  { %32 = dma.hbm_to_vmem [thread:$0]  %s700_s3, 1024, %s27_s25, [#allocation3], %s597_s27, %s597_s27, %s598_s28  }
   0xe   :  { %s599_s8 = smov [#allocation5]  }
   0xf   :  { %s40_s9 = sshll.u32 %s599_s8, 4  ;;  %s41_s9 = int_to_ptr.vmem [resolvable:$true] %s40_s9 }
  0x10   :  { %s558_s10 = scalar_lea.vmem %s41_s9, 1024  ;;  %p563_p6 = scmp.lt.s32.totalorder %s41_s9, %s41_s9 }
  0x11   :  { %p559_p5 = scmp.ne.s32.totalorder %s41_s9, %s558_s10  ;;  %p564_p7 = scmp.lt.s32.totalorder %s558_s10, %s558_s10 }
  0x13   :  { %p565_p8 = por %p564_p7, %p563_p6 }
  0x15   :  { %p566_p9 = pnand %p565_p8, %p559_p5 }
  0x17   :  { %569 = shalt.err (!%p566_p9)
}
  0x18   :  { %46 = dma.hbm_to_vmem [thread:$0]  %s702_s5, 1024, %s41_s9, [#allocation6], %s597_s27, %s597_s27, %s598_s28  }
  0x19   :  { %590 = dma.done.wait [#allocation3], 1024  }
  0x1a   :  { %591 = vsyncadd [#allocation3], 4294966272 }
  0x1b   :  { %592 = dma.done.wait [#allocation6], 1024  }
  0x1c   :  { %593 = vsyncadd [#allocation6], 4294966272  ;;  %v600_v0 = vmov 0.0   ;;  %vm73_vm0 = vcmask 1043456   ;;  %vm66_vm1 = vcmask 31744   ;;  %v56_v2 = vld [vmem:[%s697_s0] sm:$0xff] }
  0x1d   :  { %467 = vmatprep.subr.bf16.mxu1 %v600_v0  ;;  %v58_v1 = vld [vmem:[%s698_s1] sm:$0xf]  ;;  %v57_v3 = vld [vmem:[%s697_s0 + $0x8] sm:$0xff]  ;;  %464 = vmatprep.mubr.msk.f32.mxu0 %vm66_vm1, %v56_v2  ;;  %v514_v4 = vld [vmem:[#allocation2 + $0x38] sm:$0xff]   ;;  %vm601_vm2 = vmmov 0   ;;  %s602_s20 = smov [#allocation7]  }
  0x1e   :  { %462 = vmatprep.subr.msk.mxu0 %vm73_vm0, %v58_v1  ;;  %468 = vmatpush3.bf16.msra.mxu1 %v514_v4  ;;  %v515_v5 = vld [vmem:[#allocation2 + $0x30] sm:$0xff]   ;;  %v516_v6 = vld [vmem:[#allocation2 + $0x28] sm:$0xff]   ;;  %v517_v7 = vld [vmem:[#allocation2 + $0x20] sm:$0xff]   ;;  %s397_s21 = sshll.u32 %s602_s20, 4  ;;  %s398_s21 = int_to_ptr.vmem [resolvable:$true] %s397_s21 }
  0x1f   :  { %463 = vmatpush3.msk.msra.mxu0 %vm73_vm0, %v58_v1  ;;  %469 = vmatprep.subr.bf16.mxu1 %v600_v0  ;;  %v518_v8 = vld [vmem:[#allocation2 + $0x18] sm:$0xff]   ;;  %v519_v9 = vld [vmem:[#allocation2 + $0x10] sm:$0xff]   ;;  %v520_v10 = vld [vmem:[#allocation2 + $0x8] sm:$0xff]   ;;  %p575_p11 = scmp.lt.s32.totalorder %s398_s21, %s398_s21 }
  0x20   :  { %465 = vmatmul.mubr.msk.f32.vlgmr.msra.gmra.mxu0 %vm66_vm1, %v57_v3  ;;  %487 = vmatprep.subr.bf16.mxu0 %v600_v0  ;;  %v521_v11 = vld [vmem:[#allocation2] sm:$0xff]   ;;  %v522_v12 = vld [vmem:[#allocation5 + $0x38] sm:$0xff]   ;;  %v523_v13 = vld [vmem:[#allocation5 + $0x30] sm:$0xff]  }
  0x21   :  { %483 = vmatprep.mubr.msk.bf16.mxu1 %vm601_vm2, %v600_v0  ;;  %503 = vmatprep.mubr.msk.bf16.mxu0 %vm601_vm2, %v600_v0  ;;  %v524_v14 = vld [vmem:[#allocation5 + $0x28] sm:$0xff]   ;;  %v525_v15 = vld [vmem:[#allocation5 + $0x20] sm:$0xff]   ;;  %v526_v16 = vld [vmem:[#allocation5 + $0x18] sm:$0xff]  }
  0x22   :  { %470 = vmatpush3.bf16.msra.mxu1 %v515_v5  ;;  %488 = vmatpush3.bf16.msra.mxu0 %v522_v12  ;;  %v410_v17 = vld [vmem:[%s699_s2] ss:$0 sm:$0xff]  ;;  %v527_v25 = vld [vmem:[#allocation5 + $0x10] sm:$0xff]   ;;  %v528_v26 = vld [vmem:[#allocation5 + $0x8] sm:$0xff]  }
  0x23   :  { %471 = vmatprep.subr.bf16.mxu1 %v600_v0  ;;  %489 = vmatprep.subr.bf16.mxu0 %v600_v0  ;;  %v529_v27 = vld [vmem:[#allocation5] sm:$0xff]  }
  0x24   :  { %v414_v28 = vld [vmem:[%s701_s4] ss:$0 sm:$0xff]  ;;  %s570_s4 = scalar_lea.vmem %s398_s21, 128 }
  0x25   :  { %v423_v39 = vld [vmem:[%s703_s6] ss:$0 sm:$0xff]  ;;  %p571_p10 = scmp.ne.s32.totalorder %s398_s21, %s570_s4  ;;  %p576_p12 = scmp.lt.s32.totalorder %s570_s4, %s570_s4 }
  0x26   :  { %472 = vmatpush3.bf16.msra.mxu1 %v516_v6  ;;  %490 = vmatpush3.bf16.msra.mxu0 %v523_v13 }
  0x27   :  { %473 = vmatprep.subr.bf16.mxu1 %v600_v0  ;;  %491 = vmatprep.subr.bf16.mxu0 %v600_v0  ;;  %p577_p13 = por %p576_p12, %p575_p11 }
  0x29   :  { %p578_p0 = pnand %p577_p13, %p571_p10 }
  0x2a   :  { %474 = vmatpush3.bf16.msra.mxu1 %v517_v7  ;;  %492 = vmatpush3.bf16.msra.mxu0 %v524_v14 }
  0x2b   :  { %475 = vmatprep.subr.bf16.mxu1 %v600_v0  ;;  %493 = vmatprep.subr.bf16.mxu0 %v600_v0 }
  0x2e   :  { %476 = vmatpush3.bf16.msra.mxu1 %v518_v8  ;;  %494 = vmatpush3.bf16.msra.mxu0 %v525_v15 }
  0x2f   :  { %477 = vmatprep.subr.bf16.mxu1 %v600_v0  ;;  %495 = vmatprep.subr.bf16.mxu0 %v600_v0 }
  0x32   :  { %478 = vmatpush3.bf16.msra.mxu1 %v519_v9  ;;  %496 = vmatpush3.bf16.msra.mxu0 %v526_v16 }
  0x33   :  { %479 = vmatprep.subr.bf16.mxu1 %v600_v0  ;;  %497 = vmatprep.subr.bf16.mxu0 %v600_v0 }
  0x36   :  { %480 = vmatpush3.bf16.msra.mxu1 %v520_v10  ;;  %498 = vmatpush3.bf16.msra.mxu0 %v527_v25 }
  0x37   :  { %481 = vmatprep.subr.bf16.mxu1 %v600_v0  ;;  %499 = vmatprep.subr.bf16.mxu0 %v600_v0 }
  0x3a   :  { %482 = vmatpush3.bf16.msra.mxu1 %v521_v11  ;;  %500 = vmatpush3.bf16.msra.mxu0 %v528_v26 }
  0x3b   :  { %501 = vmatprep.subr.bf16.mxu0 %v600_v0 }
  0x3e   :  { %502 = vmatpush3.bf16.msra.mxu0 %v529_v27 }
  0xe0   :  { %v466_v18 = vpop.f32.mrf.mxu0 }
  0xe1   :  { %v149_v19 = vadd.f32 %v466_v18, %v410_v17 }
  0xe2   :  { %v143_v20 = vpop.f32.mrf.mxu0 }
  0xe3   :  { %v144_v21 = vadd.f32 %v410_v17, %v143_v20  ;;  %v153_v22 = vmax.f32 %v149_v19, 0.0 }
  0xe5   :  { %v152_v23 = vmax.f32 %v144_v21, 0.0 }
  0xe7   :  { %v154_v24 = vpack.c.bf16 %v153_v22, %v152_v23 }
  0xe9   :  { %484 = vmatmul.mubr.bf16.vlgmr.msra.gmra.mxu1 %v154_v24 }
 0x1a9   :  { %v260_v29 = vpop.f32.mrf.mxu1 }
 0x1aa   :  { %v261_v31 = vadd.f32 %v414_v28, %v260_v29 }
 0x1ab   :  { %v485_v30 = vpop.f32.mrf.mxu1 }
 0x1ac   :  { %v267_v35 = vmax.f32 %v261_v31, 0.0 }
 0x1ad   :  { %v263_v32 = vpop.f32.mrf.mxu1 }
 0x1ae   :  { %v264_v33 = vadd.f32 %v414_v28, %v263_v32 }
 0x1af   :  { %v486_v34 = vpop.f32.mrf.mxu1 }
 0x1b0   :  { %v268_v36 = vmax.f32 %v264_v33, 0.0 }
 0x1b2   :  { %v269_v37 = vpack.c.bf16 %v268_v36, %v267_v35 }
 0x1b4   :  { %504 = vmatmul.mubr.bf16.vlgmr.msra.gmra.mxu0 %v269_v37 }
 0x274   :  { %v375_v38 = vpop.f32.mrf.mxu0 }
 0x275   :  { %v376_v42 = vadd.f32 %v423_v39, %v375_v38 }
 0x276   :  { %v505_v40 = vpop.f32.mrf.mxu0 }
 0x278   :  { %v378_v41 = vpop.f32.mrf.mxu0 }
 0x279   :  { %v379_v43 = vadd.f32 %v423_v39, %v378_v41 }
 0x27a   :  { %v506_v44 = vpop.f32.mrf.mxu0 }
 0x27b   :  { %v439_v45 = vpack.c.bf16 %v379_v43, %v376_v42 }
 0x27d   :  { %440 = vst [vmem:[#allocation7] sm:$0xff] %v439_v45  }
 0x27e   :  { %581 = shalt.err (!%p578_p0)
}
 0x27f   :  { %403 = dma.vmem_to_hbm [thread:$0]  %s398_s21, 128, %s704_s7, [#allocation4], %s597_s27, %s597_s27, %s598_s28  }
 0x280   :  { %594 = dma.done.wait [#allocation4], 128  }
 0x281   :  { %595 = vsyncadd [#allocation4], 4294967168 }
 0x282   :  { %407 = vsyncpa [#allocation3], 1 }
 0x283   :  { %408 = vsyncpa [#allocation6], 1 }
 0x284   :  { %409 = vsyncpa [#allocation4], 1 }

</bundles_post_ra>
